<compile_context>
chip_gen: v5e
topology: v5e:2x2
jax: 0.10.0
libtpu: 0.0.40
codegen_flags: <defaults>
</compile_context>

<pallas_src>
import functools

import jax
import jax.numpy as jnp
from jax.experimental import pallas as pl
from jax.experimental.pallas import tpu as pltpu


def _mlp_kernel(x_ref, w1_ref, b1_ref, w2_ref, b2_ref, o_ref):
    # Cast x to the MXU dtype in-register (keeps the input DMA at raw f32 width,
    # no wrapper-side pad/cast pass).
    x = x_ref[...].astype(w1_ref.dtype)
    # h = relu(x @ w1 + b1): bf16 MXU operands, f32 accumulation + f32 elementwise.
    h = jnp.dot(x, w1_ref[...], preferred_element_type=jnp.float32)
    h = jnp.maximum(h + b1_ref[...], 0.0)                    # [TB, H] + [1, H]
    # out = h @ w2 + b2
    out = jnp.dot(h.astype(w2_ref.dtype), w2_ref[...],
                  preferred_element_type=jnp.float32)
    o_ref[...] = (out + b2_ref[...]).astype(o_ref.dtype)     # unpadded store


def _round_up(n, m):
    return ((n + m - 1) // m) * m


def prepare_params(w1, b1, w2, b2, *, mm_dtype=jnp.bfloat16):
    """One-time parameter prep (hoisted out of the per-call forward).

    Casts weight matrices to the MXU dtype and reshapes biases to (1, N) so the
    forward pass does zero per-call padding / casting work on the parameters.
    """
    return (
        jnp.asarray(w1, mm_dtype),
        jnp.asarray(b1, jnp.float32).reshape(1, -1),
        jnp.asarray(w2, mm_dtype),
        jnp.asarray(b2, jnp.float32).reshape(1, -1),
    )


@functools.partial(jax.jit, static_argnames=("block_batch",))
def liner_qnet_forward(x, w1, b1, w2, b2, *, block_batch=2048):
    """Fused LinerQNet forward: relu(x @ w1 + b1) @ w2 + b2.

    x : [batch, input_size] float32
    w1: [input_size, hidden_size]  (pre-cast via prepare_params; transposed vs torch)
    b1: [1, hidden_size] float32
    w2: [hidden_size, output_size]
    b2: [1, output_size] float32
    returns [batch, output_size] float32
    """
    batch, in_size = x.shape
    hidden = w1.shape[1]
    out_size = w2.shape[1]

    # Batch tiling (shapes are static under jit):
    #  * small batch: one block covering the whole array -> no padding at all.
    #  * large batch: >= 2 tiles (feeds both v7x TCs), tiles up to block_batch rows
    #    (amortizes per-grid-step overhead on single-TC v5e/v6e).
    if batch <= 256:
        tb = batch
        b_pad = batch
    else:
        tb = min(block_batch, _round_up(pl.cdiv(batch, 2), 8))
        b_pad = _round_up(batch, tb)

    if b_pad != batch:
        # Zero-filled extra rows only (at most tb-1); feature dims stay unpadded.
        xin = jnp.zeros((b_pad, in_size), x.dtype).at[:batch, :].set(x)
    else:
        xin = x

    grid = (b_pad // tb,)

    cost = pl.CostEstimate(
        flops=2 * b_pad * (in_size * hidden + hidden * out_size),
        transcendentals=0,
        bytes_accessed=(xin.size * xin.dtype.itemsize
                        + w1.size * w1.dtype.itemsize
                        + b1.size * b1.dtype.itemsize
                        + w2.size * w2.dtype.itemsize
                        + b2.size * b2.dtype.itemsize
                        + b_pad * out_size * 4),
    )

    out = pl.pallas_call(
        _mlp_kernel,
        out_shape=jax.ShapeDtypeStruct((b_pad, out_size), jnp.float32),
        grid_spec=pltpu.PrefetchScalarGridSpec(
            num_scalar_prefetch=0,
            grid=grid,
            in_specs=[
                pl.BlockSpec((tb, in_size), lambda i: (i, 0)),       # x batch tile (raw f32)
                pl.BlockSpec((in_size, hidden), lambda i: (0, 0)),   # w1 pinned / resident
                pl.BlockSpec((1, hidden), lambda i: (0, 0)),         # b1 pinned
                pl.BlockSpec((hidden, out_size), lambda i: (0, 0)),  # w2 pinned
                pl.BlockSpec((1, out_size), lambda i: (0, 0)),       # b2 pinned
            ],
            out_specs=pl.BlockSpec((tb, out_size), lambda i: (i, 0)),
        ),
        compiler_params=pltpu.CompilerParams(
            # Batch tiles are independent -> megacore (v7x 2 TCs) splits them.
            dimension_semantics=("parallel",),
        ),
        cost_estimate=cost,
    )(xin, w1, b1, w2, b2)

    if b_pad != batch:
        out = out[:batch]
    return out


def init_params(key, input_size, hidden_size, output_size):
    """Deterministic init mimicking nn.Linear's U(-1/sqrt(fan_in), 1/sqrt(fan_in))."""
    k1, k2, k3, k4 = jax.random.split(key, 4)
    bound1 = 1.0 / jnp.sqrt(input_size)
    bound2 = 1.0 / jnp.sqrt(hidden_size)
    w1 = jax.random.uniform(k1, (input_size, hidden_size), jnp.float32, -bound1, bound1)
    b1 = jax.random.uniform(k2, (hidden_size,), jnp.float32, -bound1, bound1)
    w2 = jax.random.uniform(k3, (hidden_size, output_size), jnp.float32, -bound2, bound2)
    b2 = jax.random.uniform(k4, (output_size,), jnp.float32, -bound2, bound2)
    return w1, b1, w2, b2


def _reference(x, w1, b1, w2, b2):
    """Pure-JAX reference mirroring the kernel's bf16 operand rounding."""
    xq = x.astype(jnp.bfloat16).astype(jnp.float32)
    w1q = w1.astype(jnp.bfloat16).astype(jnp.float32)
    w2q = w2.astype(jnp.bfloat16).astype(jnp.float32)
    h = jnp.maximum(xq @ w1q + b1[None, :], 0.0)
    # Note: kernel rounds the post-ReLU activations to bf16 before the 2nd matmul.
    h = h.astype(jnp.bfloat16).astype(jnp.float32)
    return h @ w2q + b2[None, :]


if __name__ == "__main__":
    # Shapes consistent with the module: batch=2, input=16, hidden=32, output=4.
    input_size, hidden_size, output_size = 16, 32, 4

    key = jax.random.PRNGKey(0)
    kx, kp, kb = jax.random.split(key, 3)
    w1, b1, w2, b2 = init_params(kp, input_size, hidden_size, output_size)
    # One-time parameter prep (bf16 cast + bias reshape) — hoisted out of forward.
    w1p, b1p, w2p, b2p = prepare_params(w1, b1, w2, b2)

    # 1) Tiny inference-style call (batch=2) — single full-array block, zero padding.
    x_small = jax.random.normal(kx, (2, input_size), jnp.float32)
    out_small = liner_qnet_forward(x_small, w1p, b1p, w2p, b2p)
    jax.block_until_ready(out_small)
    ref_small = _reference(x_small, w1, b1, w2, b2)
    assert out_small.shape == (2, output_size)
    assert jnp.allclose(out_small, ref_small, atol=2e-3, rtol=2e-3)

    # 2) Batched training-style call — 2 parallel batch tiles of 256 rows.
    x_big = jax.random.normal(kb, (512, input_size), jnp.float32)
    out_big = liner_qnet_forward(x_big, w1p, b1p, w2p, b2p)
    jax.block_until_ready(out_big)
    ref_big = _reference(x_big, w1, b1, w2, b2)
    assert out_big.shape == (512, output_size)
    assert jnp.allclose(out_big, ref_big, atol=2e-3, rtol=2e-3)

    print("KERNEL_OK")
</pallas_src>

<mosaic_0001>
module attributes {stable_mosaic.version = 11 : i64} {
  func.func @_mlp_kernel(%arg0: i32, %arg1: memref<2x16xf32, #tpu.memory_space<vmem>>, %arg2: memref<16x32xbf16, #tpu.memory_space<vmem>>, %arg3: memref<1x32xf32, #tpu.memory_space<vmem>>, %arg4: memref<32x4xbf16, #tpu.memory_space<vmem>>, %arg5: memref<1x4xf32, #tpu.memory_space<vmem>>, %arg6: memref<2x4xf32, #tpu.memory_space<vmem>>) attributes {dimension_semantics = [#tpu.dimension_semantics<parallel>], iteration_bounds = array<i64: 1>, scalar_prefetch = 0 : i64, scratch_operands = 0 : i64, tpu.core_type = #tpu.core_type<tc>, window_params = [{transform_indices = @transform_0, window_bounds = array<i64: 2, 16>}, {pipeline_mode = #tpu.pipeline_mode<synchronous>, transform_indices = @transform_1, window_bounds = array<i64: 16, 32>}, {pipeline_mode = #tpu.pipeline_mode<synchronous>, transform_indices = @transform_2, window_bounds = array<i64: 1, 32>}, {pipeline_mode = #tpu.pipeline_mode<synchronous>, transform_indices = @transform_3, window_bounds = array<i64: 32, 4>}, {pipeline_mode = #tpu.pipeline_mode<synchronous>, transform_indices = @transform_4, window_bounds = array<i64: 1, 4>}, {transform_indices = @transform_5, window_bounds = array<i64: 2, 4>}]} {
    %c0 = arith.constant 0 : index
    %c0_0 = arith.constant 0 : index
    %0 = vector.load %arg1[%c0, %c0_0] : memref<2x16xf32, #tpu.memory_space<vmem>>, vector<2x16xf32>
    %1 = arith.truncf %0 : vector<2x16xf32> to vector<2x16xbf16>
    %c0_1 = arith.constant 0 : index
    %c0_2 = arith.constant 0 : index
    %2 = vector.load %arg2[%c0_1, %c0_2] : memref<16x32xbf16, #tpu.memory_space<vmem>>, vector<16x32xbf16>
    %cst = arith.constant dense<0.000000e+00> : vector<2x32xf32>
    %3 = tpu.matmul %1, %2, %cst {dimension_numbers = #tpu.dot_dimension_numbers<[1], [0], [0], [1], [0, 0, 1, 1], [], []>} : vector<2x16xbf16>, vector<16x32xbf16>, vector<2x32xf32> -> vector<2x32xf32>
    %c0_3 = arith.constant 0 : index
    %c0_4 = arith.constant 0 : index
    %4 = vector.load %arg3[%c0_3, %c0_4] : memref<1x32xf32, #tpu.memory_space<vmem>>, vector<1x32xf32>
    %5 = vector.broadcast %4 : vector<1x32xf32> to vector<2x32xf32>
    %6 = arith.addf %3, %5 : vector<2x32xf32>
    %cst_5 = arith.constant 0.000000e+00 : f32
    %7 = vector.broadcast %cst_5 : f32 to vector<2x32xf32>
    %8 = arith.maximumf %6, %7 : vector<2x32xf32>
    %9 = arith.truncf %8 : vector<2x32xf32> to vector<2x32xbf16>
    %c0_6 = arith.constant 0 : index
    %c0_7 = arith.constant 0 : index
    %10 = vector.load %arg4[%c0_6, %c0_7] : memref<32x4xbf16, #tpu.memory_space<vmem>>, vector<32x4xbf16>
    %cst_8 = arith.constant dense<0.000000e+00> : vector<2x4xf32>
    %11 = tpu.matmul %9, %10, %cst_8 {dimension_numbers = #tpu.dot_dimension_numbers<[1], [0], [0], [1], [0, 0, 1, 1], [], []>} : vector<2x32xbf16>, vector<32x4xbf16>, vector<2x4xf32> -> vector<2x4xf32>
    %c0_9 = arith.constant 0 : index
    %c0_10 = arith.constant 0 : index
    %12 = vector.load %arg5[%c0_9, %c0_10] : memref<1x4xf32, #tpu.memory_space<vmem>>, vector<1x4xf32>
    %13 = vector.broadcast %12 : vector<1x4xf32> to vector<2x4xf32>
    %14 = arith.addf %11, %13 : vector<2x4xf32>
    %c0_11 = arith.constant 0 : index
    %c0_12 = arith.constant 0 : index
    %15 = vector.load %arg6[%c0_11, %c0_12] : memref<2x4xf32, #tpu.memory_space<vmem>>, vector<2x4xf32>
    tpu.vector_store %arg6[%c0_11, %c0_12], %14 {strides = array<i32>} : memref<2x4xf32, #tpu.memory_space<vmem>>, vector<2x4xf32>,
    return
  }
  func.func @transform_0(%arg0: i32) -> (i32, i32) {
    %c0_i32 = arith.constant 0 : i32
    %c0_i32_0 = arith.constant 0 : i32
    return %arg0, %c0_i32 : i32, i32
  }
  func.func @transform_1(%arg0: i32) -> (i32, i32) {
    %c0_i32 = arith.constant 0 : i32
    %c0_i32_0 = arith.constant 0 : i32
    %c0_i32_1 = arith.constant 0 : i32
    return %c0_i32, %c0_i32_0 : i32, i32
  }
  func.func @transform_2(%arg0: i32) -> (i32, i32) {
    %c0_i32 = arith.constant 0 : i32
    %c0_i32_0 = arith.constant 0 : i32
    %c0_i32_1 = arith.constant 0 : i32
    return %c0_i32, %c0_i32_0 : i32, i32
  }
  func.func @transform_3(%arg0: i32) -> (i32, i32) {
    %c0_i32 = arith.constant 0 : i32
    %c0_i32_0 = arith.constant 0 : i32
    %c0_i32_1 = arith.constant 0 : i32
    return %c0_i32, %c0_i32_0 : i32, i32
  }
  func.func @transform_4(%arg0: i32) -> (i32, i32) {
    %c0_i32 = arith.constant 0 : i32
    %c0_i32_0 = arith.constant 0 : i32
    %c0_i32_1 = arith.constant 0 : i32
    return %c0_i32, %c0_i32_0 : i32, i32
  }
  func.func @transform_5(%arg0: i32) -> (i32, i32) {
    %c0_i32 = arith.constant 0 : i32
    %c0_i32_0 = arith.constant 0 : i32
    return %arg0, %c0_i32 : i32, i32
  }
}

</mosaic_0001>

<bundles_post_ra>
// kernel: liner_qnet_forward.1
= control target key start
LH: loop header
LB: loop body
LE: loop exit
PB: predicated region body
PF: predicated region fallthrough
CT: control target
= control target key end

     0   :  { %s208_s0 = inlined_call_operand.vmem [shape: f32[2,16], index: 0, kind: input, shape index: {}]   ;;  %s209_s1 = inlined_call_operand.vmem [shape: bf16[16,32], index: 1, kind: input, shape index: {}]   ;;  %s210_s2 = inlined_call_operand.vmem [shape: f32[1,32], index: 2, kind: input, shape index: {}]   ;;  %s211_s3 = inlined_call_operand.vmem [shape: bf16[32,4], index: 3, kind: input, shape index: {}]   ;;  %s212_s4 = inlined_call_operand.vmem [shape: f32[1,4], index: 4, kind: input, shape index: {}]   ;;  %s213_s5 = inlined_call_operand.hbm [shape: f32[2,4], index: 5, kind: output, shape index: {}]  }
   0x1   :  { %v124_v0 = vld [vmem:[%s209_s1] sm:$0xff] }
   0x2   :  { %v22_v1 = vld [vmem:[%s208_s0] sm:$0x3] }
   0x3   :  { %v23_v2 = vpack.c.bf16 %v22_v1, %v22_v1 }
   0x4   :  { %10 = vsyncpa [#allocation3], 0  ;;  %47 = vmatpush.bf16.msra.mxu0 %v124_v0  ;;  %vm36_vm0 = vcmask 130048   ;;  %v126_v3 = vld [vmem:[%s211_s3 + $0x8] sm:$0xff]  ;;  %v125_v4 = vld [vmem:[%s211_s3] sm:$0xff]  ;;  %vm75_vm1 = vcmask 261120  }
   0x5   :  { %85 = vmatpush.bf16.msra.mxu1 %v126_v3  ;;  %v128_v5 = vld [vmem:[%s210_s2] ss:$0 sm:$0xff]  ;;  %s156_s28 = smov [#allocation2]   ;;  %s101_s6 = sshll.u32 %s213_s5, 4  ;;  %vm92_vm2 = vcmask 25600   ;;  %s102_s6 = int_to_ptr.hbm [resolvable:$true] %s101_s6 }
   0x6   :  { %v129_v11 = vld [vmem:[%s212_s4] ss:$0 sm:$0xff]  ;;  %s99_s29 = sshll.u32 %s156_s28, 4  ;;  %s100_s29 = int_to_ptr.vmem [resolvable:$true] %s99_s29 }
   0x7   :  { %114 = vmatmul.msk.bf16.vlgmr.msra.gmra.mxu0 %vm36_vm0, %v23_v2 }
   0x9   :  { %86 = vmatpush.bf16.msra.mxu1 %v125_v4 }
  0x84   :  { %v49_v6 = vpop.f32.mrf.mxu0 }
  0x85   :  { %v50_v7 = vadd.f32 %v128_v5, %v49_v6 }
  0x87   :  { %v53_v8 = vmax.f32 %v50_v7, 0.0 }
  0x89   :  { %v54_v9 = vpack.c.bf16 %v53_v8, %v53_v8 }
  0x8b   :  { %123 = vmatmul.msk.bf16.vlgmr.msra.gmra.mxu1 %vm75_vm1, %v54_v9 }
  0x8c   :  { %v51_v10 = vpop.f32.mrf.mxu0 }
 0x108   :  { %v88_v12 = vpop.f32.mrf.mxu1 }
 0x109   :  { %v89_v13 = vadd.f32 %v129_v11, %v88_v12 }
 0x10b   :  { %93 = vst.msk [vmem:[#allocation2] sm:$0x3] %vm92_vm2, %v89_v13 }
 0x10c   :  { %104 = dma.vmem_to_hbm [thread:$0]  %s100_s29, 32, %s102_s6, [#allocation3]  }
 0x110   :  { %v90_v14 = vpop.f32.mrf.mxu1 }
 0x111   :  { %154 = dma.done.wait [#allocation3], 32  }
 0x112   :  { %155 = vsyncadd [#allocation3], 4294967264 }
 0x113   :  { %109 = vsyncpa [#allocation3], 1 }

</bundles_post_ra>
